<compile_context>
chip_gen: v7x
topology: tpu7x:2x2x1
jax: 0.10.0
libtpu: 0.0.40
codegen_flags: <defaults>
</compile_context>

<pallas_src>
import functools

import jax
import jax.numpy as jnp
import numpy as np
from jax.experimental import pallas as pl
from jax.experimental.pallas import tpu as pltpu


def _round_up(v, m):
    return (v + m - 1) // m * m


def _largest_divisor_leq(n, cap):
    cap = max(1, min(n, cap))
    for g in range(cap, 0, -1):
        if n % g == 0:
            return g
    return 1


@functools.lru_cache(maxsize=None)
def _roll_follows_numpy_convention() -> bool:
    """pltpu.roll is expected to follow jnp.roll semantics (out[i] = in[i - shift]).

    Probe once on the target backend so a convention difference across jax versions
    cannot silently flip the conv taps.
    """
    def k(x_ref, o_ref):
        o_ref[...] = pltpu.roll(x_ref[...], shift=1, axis=1)

    x = jnp.broadcast_to(jnp.arange(128, dtype=jnp.float32), (8, 128))
    y = np.asarray(jax.block_until_ready(
        pl.pallas_call(k, out_shape=jax.ShapeDtypeStruct((8, 128), jnp.float32))(x)))
    if y[0, 0] == 127.0 and y[0, 1] == 0.0:
        return True          # numpy convention: out[i] = in[i - shift]
    if y[0, 0] == 1.0 and y[0, 1] == 2.0:
        return False         # opposite convention: out[i] = in[i + shift]
    raise RuntimeError("unexpected pltpu.roll semantics")


# ---------------------------------------------------------------------------
# Pallas kernel: one lane tile (a contiguous group of whole strips).
#   x_ref: (Cin_pad, T)    w_ref: (KH*KW, Cout, Cin_pad)    o_ref: (Cout, T)
# acc[:, i] = sum_{dy,dx} W[:, :, dy, dx] @ x[:, i + dy*Wp + dx]
# ---------------------------------------------------------------------------
def _focal_conv_kernel(x_ref, w_ref, o_ref, *, kh, kw, wp, roll_numpy):
    x = x_ref[...]                                   # (Cin_pad, T)
    n = x.shape[-1]
    acc = jnp.zeros((o_ref.shape[0], n), jnp.float32)
    for dy in range(kh):
        for dx in range(kw):
            s = dy * wp + dx
            if s == 0:
                xs = x
            else:
                amt = (n - s) if roll_numpy else s   # == shift by -s toward lower lanes
                xs = pltpu.roll(x, shift=amt, axis=1)
            acc = acc + jnp.dot(w_ref[dy * kw + dx], xs,
                                preferred_element_type=jnp.float32)
    o_ref[...] = acc.astype(o_ref.dtype)


# ---------------------------------------------------------------------------
# Forward wrapper.
#   x      : (B, Cin, H, W)     NCHW, same as PyTorch
#   weight : (Cout, Cin, K, K)  PyTorch Conv2d weight (bias=False in the module)
# Returns  : (B, Cout, H_out_total, W_out) NCHW
# ---------------------------------------------------------------------------
@functools.partial(
    jax.jit,
    static_argnames=("halving", "stride", "padding", "lane_block", "roll_numpy"))
def _focal_conv2d_impl(x, weight, *, halving, stride, padding, lane_block, roll_numpy):
    B, Cin, H, W = x.shape
    Cout, Cin_w, KH, KW = weight.shape
    assert Cin == Cin_w
    if stride != 1:
        # TODO(synk): stride > 1 needs a strided gather of output lanes; GaitPart uses stride=1.
        raise NotImplementedError("Pallas FocalConv2d path implements stride=1 only")

    ns = 1 if halving == 0 else 2 ** halving
    # TODO(synk): torch.split allows a smaller ragged tail strip when H % 2**halving != 0;
    # only the evenly divisible case (the one GaitPart uses) is implemented here.
    assert H % ns == 0, "H must be divisible by 2**halving"
    Hs = H // ns
    Hp, Wp = Hs + 2 * padding, W + 2 * padding
    Ho, Wo = Hp - KH + 1, Wp - KW + 1
    assert Ho >= 1 and Wo >= 1

    NS = B * ns                                           # total independent strips
    itemsize = jnp.dtype(x.dtype).itemsize
    sub = max(1, 4 // itemsize) * 8                       # sublane multiple: 8 f32, 16 bf16
    cin_pad = _round_up(Cin, sub)
    Lp = _round_up(Hp * Wp, 128)                          # per-strip flattened lane span
    Ntot = NS * Lp

    # --- layout plumbing (wrapper / XLA, all under jit) ---------------------------------
    xs = x.reshape(B, Cin, ns, Hs, W)
    xs = jnp.pad(xs, ((0, 0), (0, 0), (0, 0), (padding, padding), (padding, padding)))
    xs = jnp.transpose(xs, (1, 0, 2, 3, 4)).reshape(Cin, NS, Hp * Wp)
    xs = jnp.pad(xs, ((0, cin_pad - Cin), (0, 0), (0, Lp - Hp * Wp)))
    xflat = xs.reshape(cin_pad, Ntot)                     # (Cin_pad, B*ns*Lp)

    wk = jnp.transpose(weight, (2, 3, 0, 1)).reshape(KH * KW, Cout, Cin)
    wk = jnp.pad(wk, ((0, 0), (0, 0), (0, cin_pad - Cin))).astype(x.dtype)

    # --- lane tiling: groups of whole strips (no halo / cross-strip reads needed) -------
    G = _largest_divisor_leq(NS, max(1, lane_block // Lp))
    T = G * Lp
    steps = NS // G

    flops = 2 * NS * Ho * Wo * Cout * Cin * KH * KW
    bytes_accessed = (cin_pad * Ntot + KH * KW * Cout * cin_pad + Cout * Ntot) * itemsize

    kernel = functools.partial(
        _focal_conv_kernel, kh=KH, kw=KW, wp=Wp, roll_numpy=roll_numpy)

    out_flat = pl.pallas_call(
        kernel,
        out_shape=jax.ShapeDtypeStruct((Cout, Ntot), x.dtype),
        grid=(steps,),
        in_specs=[
            pl.BlockSpec((cin_pad, T), lambda i: (0, i)),            # input lane tile
            pl.BlockSpec((KH * KW, Cout, cin_pad), lambda i: (0, 0, 0)),  # resident weights
        ],
        out_specs=pl.BlockSpec((Cout, T), lambda i: (0, i)),
        compiler_params=pltpu.CompilerParams(dimension_semantics=("parallel",)),
        cost_estimate=pl.CostEstimate(
            flops=flops, transcendentals=0, bytes_accessed=bytes_accessed),
    )(xflat, wk)

    # Discard the padding lanes of every strip and reassemble NCHW (== torch.cat along H).
    out = out_flat.reshape(Cout, NS, Lp)[:, :, :Ho * Wp]
    out = out.reshape(Cout, B, ns, Ho, Wp)[..., :Wo]
    return jnp.transpose(out, (1, 0, 2, 3, 4)).reshape(B, Cout, ns * Ho, Wo)


def focal_conv2d_forward(x, weight, *, halving, stride=1, padding=0, lane_block=1024):
    # Note: the module hard-codes bias=False, so no bias path is needed.
    return _focal_conv2d_impl(
        x, weight, halving=halving, stride=stride, padding=padding,
        lane_block=lane_block, roll_numpy=_roll_follows_numpy_convention())


# ---------------------------------------------------------------------------
# Pure-JAX reference mirroring the PyTorch module (for correctness checking).
# ---------------------------------------------------------------------------
def reference_forward(x, weight, *, halving, stride=1, padding=0):
    def conv(z):
        return jax.lax.conv_general_dilated(
            z, weight,
            window_strides=(stride, stride),
            padding=[(padding, padding), (padding, padding)],
            dimension_numbers=("NCHW", "OIHW", "NCHW"),
            precision=jax.lax.Precision.HIGHEST,
        )

    if halving == 0:
        return conv(x)
    h = x.shape[2]
    split_size = h // (2 ** halving)
    chunks = [x[:, :, i * split_size:(i + 1) * split_size, :]
              for i in range(h // split_size)]
    return jnp.concatenate([conv(c) for c in chunks], axis=2)


if __name__ == "__main__":
    # Small shapes consistent with the module: x (B, C, H, W) = (2, 4, 16, 16),
    # Conv2d(4, 8, kernel_size=3, padding=1, stride=1, bias=False), halving=2
    # (-> 4 strips of height 4, each zero-padded and convolved independently).
    B, Cin, H, W = 2, 4, 16, 16
    Cout, K = 8, 3
    padding = 1

    key = jax.random.PRNGKey(0)
    k_w, k_x = jax.random.split(key)
    weight = 0.1 * jax.random.normal(k_w, (Cout, Cin, K, K), jnp.float32)
    x = jax.random.normal(k_x, (B, Cin, H, W), jnp.float32)

    # halving > 0 path (per-strip conv + concat); 512-lane tiles -> 2-step parallel grid.
    out = focal_conv2d_forward(x, weight, halving=2, padding=padding, lane_block=512)
    out = jax.block_until_ready(out)
    ref = reference_forward(x, weight, halving=2, padding=padding)
    ref = jax.block_until_ready(ref)
    assert out.shape == ref.shape == (B, Cout, H, W), (out.shape, ref.shape)
    np.testing.assert_allclose(np.asarray(out), np.asarray(ref), rtol=2e-3, atol=2e-3)

    # halving == 0 path (plain conv), default lane tile.
    out0 = focal_conv2d_forward(x, weight, halving=0, padding=padding)
    out0 = jax.block_until_ready(out0)
    ref0 = reference_forward(x, weight, halving=0, padding=padding)
    np.testing.assert_allclose(np.asarray(out0), np.asarray(ref0), rtol=2e-3, atol=2e-3)

    # bf16 inputs: bf16 MXU operands, f32 accumulation, bf16 output (module dtype preserved).
    xb, wb = x.astype(jnp.bfloat16), weight.astype(jnp.bfloat16)
    outb = focal_conv2d_forward(xb, wb, halving=2, padding=padding)
    outb = jax.block_until_ready(outb)
    refb = reference_forward(xb.astype(jnp.float32), wb.astype(jnp.float32),
                             halving=2, padding=padding)
    assert outb.dtype == jnp.bfloat16
    np.testing.assert_allclose(np.asarray(outb.astype(jnp.float32)), np.asarray(refb),
                               rtol=2e-2, atol=2e-2)

    print("KERNEL_OK")
</pallas_src>

<mosaic_0001>
module attributes {stable_mosaic.version = 11 : i64} {
  func.func @k(%arg0: memref<8x128xf32, #tpu.memory_space<vmem>>, %arg1: memref<8x128xf32, #tpu.memory_space<vmem>>) attributes {dimension_semantics = [], scalar_prefetch = 0 : i64, scratch_operands = 0 : i64, tpu.core_type = #tpu.core_type<tc>} {
    %c0 = arith.constant 0 : index
    %c0_0 = arith.constant 0 : index
    %0 = vector.load %arg0[%c0, %c0_0] : memref<8x128xf32, #tpu.memory_space<vmem>>, vector<8x128xf32>
    %c1_i32 = arith.constant 1 : i32
    %1 = tpu.dynamic_rotate %0 by %c1_i32 dim 1 : vector<8x128xf32>, i32 -> vector<8x128xf32>
    %c0_1 = arith.constant 0 : index
    %c0_2 = arith.constant 0 : index
    %2 = vector.load %arg1[%c0_1, %c0_2] : memref<8x128xf32, #tpu.memory_space<vmem>>, vector<8x128xf32>
    tpu.vector_store %arg1[%c0_1, %c0_2], %1 {strides = array<i32>} : memref<8x128xf32, #tpu.memory_space<vmem>>, vector<8x128xf32>,
    return
  }
}

</mosaic_0001>

<bundles_post_ra>
// kernel: tpu_custom_call.1
= control target key start
LH: loop header
LB: loop body
LE: loop exit
PB: predicated region body
PF: predicated region fallthrough
CT: control target
= control target key end

     0   :  { %6 = vsyncpa [#allocation3], 0  ;;  %s128_s0 = inlined_call_operand.hbm [shape: f32[8,128], index: 0, kind: input, shape index: {}]   ;;  %s129_s1 = inlined_call_operand.hbm [shape: f32[8,128], index: 1, kind: output, shape index: {}]  }
   0x1   :  { %7 = vsyncpa [#allocation4], 0  ;;  %s91_s6 = smov [#allocation2]   ;;  %s43_s10 = scalar_lea.hbm %s128_s0, 128 }
   0x2   :  { %s14_s7 = sshll.u32 %s91_s6, 4  ;;  %p44_p0 = scmp.ne.s32.totalorder %s128_s0, %s43_s10  ;;  %s15_s7 = int_to_ptr.vmem [resolvable:$true] %s14_s7 }
   0x3   :  { %p47_p1 = scmp.lt.u32.totalorder %s43_s10, %s128_s0 }
   0x5   :  { %p49_p2 = pnand %p47_p1, %p44_p0 }
   0x7   :  { %52 = shalt.err (!%p49_p2)
}
   0x8   :  { %s53_s15 = scalar_lea.vmem %s15_s7, 128  ;;  %p58_p4 = scmp.lt.s32.totalorder %s15_s7, %s15_s7 }
   0x9   :  { %p54_p3 = scmp.ne.s32.totalorder %s15_s7, %s53_s15  ;;  %p59_p5 = scmp.lt.s32.totalorder %s53_s15, %s53_s15 }
   0xb   :  { %p60_p6 = por %p59_p5, %p58_p4 }
   0xd   :  { %p61_p7 = pnand %p60_p6, %p54_p3 }
   0xf   :  { %64 = shalt.err (!%p61_p7)
}
  0x10   :  { %17 = dma.hbm_to_vmem [thread:$0]  %s128_s0, 128, %s15_s7, [#allocation3]  }
  0x11   :  { %87 = dma.done.wait [#allocation3], 128  }
  0x12   :  { %88 = vsyncadd [#allocation3], 4294967168  ;;  %v21_v0 = vld [vmem:[#allocation2] sm:$0xff]  ;;  %s92_s18 = smov 1   ;;  %s93_s19 = smov [#allocation5]  }
  0x13   :  { %22 = vrot.lane.b32.xlu0 %v21_v0, %s92_s18  ;;  %s31_s20 = sshll.u32 %s93_s19, 4  ;;  %s32_s20 = int_to_ptr.vmem [resolvable:$true] %s31_s20 }
  0x14   :  { %s65_s21 = scalar_lea.vmem %s32_s20, 128  ;;  %p70_p9 = scmp.lt.s32.totalorder %s32_s20, %s32_s20 }
  0x15   :  { %p66_p8 = scmp.ne.s32.totalorder %s32_s20, %s65_s21  ;;  %p71_p10 = scmp.lt.s32.totalorder %s65_s21, %s65_s21 }
  0x17   :  { %p72_p11 = por %p71_p10, %p70_p9 }
  0x19   :  { %p73_p12 = pnand %p72_p11, %p66_p8 }
  0x85   :  { %v23_v1 = vpop.permute.xlu0 %22 }
  0x86   :  { %24 = vst [vmem:[#allocation5] sm:$0xff] %v23_v1 }
  0x87   :  { %76 = shalt.err (!%p73_p12)
}
  0x88   :  { %s77_s0 = scalar_lea.hbm %s129_s1, 128 }
  0x89   :  { %p78_p13 = scmp.ne.s32.totalorder %s129_s1, %s77_s0  ;;  %p81_p0 = scmp.lt.u32.totalorder %s77_s0, %s129_s1 }
  0x8b   :  { %p83_p1 = pnand %p81_p0, %p78_p13 }
  0x8d   :  { %86 = shalt.err (!%p83_p1)
}
  0x8e   :  { %34 = dma.vmem_to_hbm [thread:$0]  %s32_s20, 128, %s129_s1, [#allocation4]  }
  0x8f   :  { %89 = dma.done.wait [#allocation4], 128  }
  0x90   :  { %90 = vsyncadd [#allocation4], 4294967168 }
  0x91   :  { %38 = vsyncpa [#allocation3], 1 }
  0x92   :  { %39 = vsyncpa [#allocation4], 1 }

</bundles_post_ra>
